<compile_context>
chip_gen: v7x
topology: tpu7x:2x2x1
jax: 0.10.0
libtpu: 0.0.40
codegen_flags: <defaults>
</compile_context>

<pallas_src>
import jax
import jax.numpy as jnp
from jax import lax
from jax.experimental import pallas as pl
from jax.experimental.pallas import tpu as pltpu


def _round_up(v, m):
    return ((v + m - 1) // m) * m


def _make_kernel(C, TL):
    def kernel(s_ref, halo_ref, wa_ref, wb_ref, b_ref, o_ref):
        # s_ref:    (1, 2C, TL)   rows [0:C] = ev = x[2j], rows [C:2C] = od = x[2j+1]
        # halo_ref: (1, 1, C, 1)  od column just left of this tile (0 for tile 0)
        # wa_ref:   (C, 2C)       [W_k1 | W_k2]
        # wb_ref:   (C, C)        W_k0
        # b_ref:    (C, 1)        bias
        # o_ref:    (1, C, TL)
        s = s_ref[0]                                   # (2C, TL)
        od = s[C:, :]                                  # (C, TL)
        halo = halo_ref[0, 0]                          # (C, 1)
        # od shifted right by one output position: od_shift[:, j] = x[2j - 1]
        od_shift = jnp.concatenate([halo, od[:, : TL - 1]], axis=1)  # (C, TL)

        acc = jnp.dot(wa_ref[...], s, preferred_element_type=jnp.float32)
        acc = acc + jnp.dot(wb_ref[...], od_shift,
                            preferred_element_type=jnp.float32)
        acc = acc + b_ref[...]                         # lane-broadcast bias add
        o_ref[0] = acc.astype(o_ref.dtype)

    return kernel


def downsample1d(x, weight, bias):
    """Conv1d(dim, dim, kernel_size=3, stride=2, padding=1).

    x:      (B, C, L)
    weight: (C, C, 3)   (out_channels, in_channels, kernel)
    bias:   (C,)
    returns (B, C, (L + 1) // 2)
    """
    B, C, L = x.shape
    L_out = (L + 1) // 2

    # ---- tiling: lane-dense 128-multiple tiles along L_out ----
    L_out_pad = _round_up(max(L_out, 1), 128)
    TL = 128
    for cand in (1024, 512, 384, 256):
        if L_out_pad % cand == 0:
            TL = cand
            break
    n_t = L_out_pad // TL

    # ---- glue (plain JAX, ~1x input traffic) ----
    Lp = 2 * L_out_pad
    x_e = jnp.pad(x, ((0, 0), (0, 0), (0, Lp - L)))            # (B, C, Lp)

    # De-interleaved slab: rows [0:C] = ev = x[2j], rows [C:2C] = od = x[2j+1].
    slab = (x_e.reshape(B, C, L_out_pad, 2)
                .transpose(0, 3, 1, 2)
                .reshape(B, 2 * C, L_out_pad))                  # (B, 2C, L_out_pad)

    # Left halo per tile: halo[b, t] = x[b, :, 2*t*TL - 1]  (zero for t == 0).
    if n_t > 1:
        h = x_e[:, :, 2 * TL - 1:: 2 * TL][:, :, : n_t - 1]     # (B, C, n_t-1)
        halo = jnp.concatenate([jnp.zeros((B, C, 1), x.dtype), h], axis=2)
    else:
        halo = jnp.zeros((B, C, 1), x.dtype)
    halo = halo.transpose(0, 2, 1)[..., None]                   # (B, n_t, C, 1)

    # Weights: fused [W1 | W2] for the [ev; od] slab, W0 for the shifted od.
    wa = jnp.concatenate([weight[:, :, 1], weight[:, :, 2]], axis=1)  # (C, 2C)
    wb = weight[:, :, 0]                                              # (C, C)
    b_col = bias.reshape(C, 1)                                        # (C, 1)

    # ---- compiler params (explicit VMEM budget only when it matters) ----
    vmem_est = 4 * (2 * (2 * C * TL) + 2 * (C * TL)      # in/out double buffers
                    + 2 * (3 * C * C + C) + 2 * C)       # weights + halo
    cp_kwargs = dict(dimension_semantics=("parallel", "parallel"))
    if vmem_est > 12 * 1024 * 1024:
        cp_kwargs["vmem_limit_bytes"] = min(2 * vmem_est, 48 * 1024 * 1024)

    out = pl.pallas_call(
        _make_kernel(C, TL),
        out_shape=jax.ShapeDtypeStruct((B, C, L_out_pad), x.dtype),
        grid_spec=pltpu.PrefetchScalarGridSpec(
            num_scalar_prefetch=0,
            grid=(B, n_t),
            in_specs=[
                pl.BlockSpec((1, 2 * C, TL), lambda b, t: (b, 0, t)),
                pl.BlockSpec((1, 1, C, 1), lambda b, t: (b, t, 0, 0)),
                pl.BlockSpec((C, 2 * C), lambda b, t: (0, 0)),
                pl.BlockSpec((C, C), lambda b, t: (0, 0)),
                pl.BlockSpec((C, 1), lambda b, t: (0, 0)),
            ],
            out_specs=pl.BlockSpec((1, C, TL), lambda b, t: (b, 0, t)),
        ),
        compiler_params=pltpu.CompilerParams(**cp_kwargs),
    )(slab, halo, wa, wb, b_col)

    return out[:, :, :L_out]


def _reference_conv1d(x, weight, bias):
    # Pure-JAX reference (mirrors torch.nn.Conv1d(dim, dim, 3, 2, 1)).
    out = lax.conv_general_dilated(
        x,
        weight,
        window_strides=(2,),
        padding=((1, 1),),
        dimension_numbers=("NCH", "OIH", "NCH"),
    )
    return out + bias.reshape(1, -1, 1)


if __name__ == "__main__":
    B, C, L = 2, 4, 16  # batch=2, dim=4, spatial length=16

    key = jax.random.PRNGKey(0)
    kx, kw, kb = jax.random.split(key, 3)

    x = jax.random.normal(kx, (B, C, L), dtype=jnp.float32)
    # Deterministic synthetic Conv1d parameters (shapes from nn.Conv1d(dim, dim, 3)).
    fan_in = C * 3
    bound = 1.0 / (fan_in ** 0.5)
    weight = jax.random.uniform(kw, (C, C, 3), jnp.float32, -bound, bound)
    bias = jax.random.uniform(kb, (C,), jnp.float32, -bound, bound)

    y = downsample1d(x, weight, bias)
    y = jax.block_until_ready(y)

    y_ref = _reference_conv1d(x, weight, bias)
    assert y.shape == (B, C, (L + 1) // 2)
    assert jnp.allclose(y, y_ref, atol=1e-5, rtol=1e-5)

    print("KERNEL_OK")
</pallas_src>

<mosaic_0001>
module attributes {stable_mosaic.version = 11 : i64} {
  func.func @kernel(%arg0: i32, %arg1: i32, %arg2: memref<1x8x128xf32, #tpu.memory_space<vmem>>, %arg3: memref<1x1x4x1xf32, #tpu.memory_space<vmem>>, %arg4: memref<4x8xf32, #tpu.memory_space<vmem>>, %arg5: memref<4x4xf32, #tpu.memory_space<vmem>>, %arg6: memref<4x1xf32, #tpu.memory_space<vmem>>, %arg7: memref<1x4x128xf32, #tpu.memory_space<vmem>>) attributes {dimension_semantics = [#tpu.dimension_semantics<parallel>, #tpu.dimension_semantics<parallel>], iteration_bounds = array<i64: 2, 1>, scalar_prefetch = 0 : i64, scratch_operands = 0 : i64, tpu.core_type = #tpu.core_type<tc>, window_params = [{transform_indices = @transform_0, window_bounds = array<i64: 1, 8, 128>}, {transform_indices = @transform_1, window_bounds = array<i64: 1, 1, 4, 1>}, {pipeline_mode = #tpu.pipeline_mode<synchronous>, transform_indices = @transform_2, window_bounds = array<i64: 4, 8>}, {pipeline_mode = #tpu.pipeline_mode<synchronous>, transform_indices = @transform_3, window_bounds = array<i64: 4, 4>}, {pipeline_mode = #tpu.pipeline_mode<synchronous>, transform_indices = @transform_4, window_bounds = array<i64: 4, 1>}, {transform_indices = @transform_5, window_bounds = array<i64: 1, 4, 128>}]} {
    %c0 = arith.constant 0 : index
    %c0_0 = arith.constant 0 : index
    %c0_1 = arith.constant 0 : index
    %0 = vector.load %arg2[%c0, %c0_0, %c0_1] : memref<1x8x128xf32, #tpu.memory_space<vmem>>, vector<1x8x128xf32>
    %1 = vector.shape_cast %0 : vector<1x8x128xf32> to vector<8x128xf32>
    %2 = vector.extract_strided_slice %1 {offsets = [4, 0], sizes = [4, 128], strides = [1, 1]} : vector<8x128xf32> to vector<4x128xf32>
    %c0_2 = arith.constant 0 : index
    %c0_3 = arith.constant 0 : index
    %c0_4 = arith.constant 0 : index
    %c0_5 = arith.constant 0 : index
    %3 = vector.load %arg3[%c0_2, %c0_3, %c0_4, %c0_5] : memref<1x1x4x1xf32, #tpu.memory_space<vmem>>, vector<1x1x4x1xf32>
    %4 = vector.shape_cast %3 : vector<1x1x4x1xf32> to vector<4x1xf32>
    %5 = vector.extract_strided_slice %2 {offsets = [0, 0], sizes = [4, 127], strides = [1, 1]} : vector<4x128xf32> to vector<4x127xf32>
    %6 = tpu.concatenate %4, %5 in 1 : vector<4x1xf32>, vector<4x127xf32> -> vector<4x128xf32>
    %c0_6 = arith.constant 0 : index
    %c0_7 = arith.constant 0 : index
    %7 = vector.load %arg4[%c0_6, %c0_7] : memref<4x8xf32, #tpu.memory_space<vmem>>, vector<4x8xf32>
    %cst = arith.constant dense<0.000000e+00> : vector<4x128xf32>
    %8 = tpu.matmul %7, %1, %cst {dimension_numbers = #tpu.dot_dimension_numbers<[1], [0], [0], [1], [0, 0, 1, 1], [], []>} : vector<4x8xf32>, vector<8x128xf32>, vector<4x128xf32> -> vector<4x128xf32>
    %c0_8 = arith.constant 0 : index
    %c0_9 = arith.constant 0 : index
    %9 = vector.load %arg5[%c0_8, %c0_9] : memref<4x4xf32, #tpu.memory_space<vmem>>, vector<4x4xf32>
    %cst_10 = arith.constant dense<0.000000e+00> : vector<4x128xf32>
    %10 = tpu.matmul %9, %6, %cst_10 {dimension_numbers = #tpu.dot_dimension_numbers<[1], [0], [0], [1], [0, 0, 1, 1], [], []>} : vector<4x4xf32>, vector<4x128xf32>, vector<4x128xf32> -> vector<4x128xf32>
    %11 = arith.addf %8, %10 : vector<4x128xf32>
    %c0_11 = arith.constant 0 : index
    %c0_12 = arith.constant 0 : index
    %12 = vector.load %arg6[%c0_11, %c0_12] : memref<4x1xf32, #tpu.memory_space<vmem>>, vector<4x1xf32>
    %13 = vector.broadcast %12 : vector<4x1xf32> to vector<4x128xf32>
    %14 = arith.addf %11, %13 : vector<4x128xf32>
    %c0_13 = arith.constant 0 : index
    %c0_14 = arith.constant 0 : index
    %c0_15 = arith.constant 0 : index
    %15 = vector.load %arg7[%c0_13, %c0_14, %c0_15] : memref<1x4x128xf32, #tpu.memory_space<vmem>>, vector<1x4x128xf32>
    %16 = vector.shape_cast %15 : vector<1x4x128xf32> to vector<4x128xf32>
    %17 = vector.shape_cast %14 : vector<4x128xf32> to vector<1x4x128xf32>
    tpu.vector_store %arg7[%c0_13, %c0_14, %c0_15], %17 {strides = array<i32>} : memref<1x4x128xf32, #tpu.memory_space<vmem>>, vector<1x4x128xf32>,
    return
  }
  func.func @transform_0(%arg0: i32, %arg1: i32) -> (i32, i32, i32) {
    %c0_i32 = arith.constant 0 : i32
    %c0_i32_0 = arith.constant 0 : i32
    return %arg0, %c0_i32, %arg1 : i32, i32, i32
  }
  func.func @transform_1(%arg0: i32, %arg1: i32) -> (i32, i32, i32, i32) {
    %c0_i32 = arith.constant 0 : i32
    %c0_i32_0 = arith.constant 0 : i32
    %c0_i32_1 = arith.constant 0 : i32
    return %arg0, %arg1, %c0_i32, %c0_i32_0 : i32, i32, i32, i32
  }
  func.func @transform_2(%arg0: i32, %arg1: i32) -> (i32, i32) {
    %c0_i32 = arith.constant 0 : i32
    %c0_i32_0 = arith.constant 0 : i32
    %c0_i32_1 = arith.constant 0 : i32
    return %c0_i32, %c0_i32_0 : i32, i32
  }
  func.func @transform_3(%arg0: i32, %arg1: i32) -> (i32, i32) {
    %c0_i32 = arith.constant 0 : i32
    %c0_i32_0 = arith.constant 0 : i32
    %c0_i32_1 = arith.constant 0 : i32
    return %c0_i32, %c0_i32_0 : i32, i32
  }
  func.func @transform_4(%arg0: i32, %arg1: i32) -> (i32, i32) {
    %c0_i32 = arith.constant 0 : i32
    %c0_i32_0 = arith.constant 0 : i32
    %c0_i32_1 = arith.constant 0 : i32
    return %c0_i32, %c0_i32_0 : i32, i32
  }
  func.func @transform_5(%arg0: i32, %arg1: i32) -> (i32, i32, i32) {
    %c0_i32 = arith.constant 0 : i32
    %c0_i32_0 = arith.constant 0 : i32
    return %arg0, %c0_i32, %arg1 : i32, i32, i32
  }
}

</mosaic_0001>

<bundles_post_ra>
// kernel: tpu_custom_call.1
= control target key start
LH: loop header
LB: loop body
LE: loop exit
PB: predicated region body
PF: predicated region fallthrough
CT: control target
= control target key end

     0   :  { %10 = vsyncpa [#allocation3], 0  ;;  %s1001_s0 = inlined_call_operand.hbm [shape: f32[2,8,128], index: 0, kind: input, shape index: {}]   ;;  %s1002_s1 = inlined_call_operand.vmem [shape: f32[2,1,4,1], index: 1, kind: input, shape index: {}]   ;;  %s1003_s2 = inlined_call_operand.vmem [shape: f32[4,8], index: 2, kind: input, shape index: {}]   ;;  %s1004_s3 = inlined_call_operand.vmem [shape: f32[4,4], index: 3, kind: input, shape index: {}]   ;;  %s1005_s4 = inlined_call_operand.vmem [shape: f32[4,1], index: 4, kind: input, shape index: {}]   ;;  %s1006_s5 = inlined_call_operand.hbm [shape: f32[2,4,128], index: 5, kind: output, shape index: {}]  }
   0x1   :  { %12 = vsyncpa [#allocation3 + $0x1], 0 }
   0x2   :  { %13 = vsyncpa [#allocation4], 0 }
   0x3   :  { %15 = vsyncpa [#allocation4 + $0x1], 0  ;;  %s814_s18 = smov 0   ;;  %s816_s19 = smov 0  }
   0x4   :  { %s818_s20 = smov 0   ;;  %s820_s21 = smov 0  }
   0x5   :  { %s822_s22 = smov 0   ;;  %s824_s23 = smov 0  }
   0x6 LB: > { %s566_s24 = sadd.s32 4294967295, %s776_s23   ;;  %s567_s25 = sadd.s32 4294967294, %s776_s23   ;;  %s776_s23 = sphi %s824_s23, %s21_s23   ;;  %s772_s22 = sphi %s822_s22, %s1022_s22   ;;  %s768_s21 = sphi %s820_s21, %s1021_s21   ;;  %s764_s20 = sphi %s818_s20, %s1020_s20   ;;  %s760_s19 = sphi %s816_s19, %s1019_s19   ;;  %s756_s18 = sphi %s814_s18, %s1018_s18  }
   0x7   : > { %s33_s26 = sadd.s32 1, %s772_s22  ;;  %s42_s27 = sadd.s32 1, %s764_s20 }
   0x8   : > { %p35_p0 = scmp.ge.s32.totalorder %s33_s26, 2  ;;  %p49_p1 = scmp.ne.s32.totalorder %s764_s20, %s760_s19 }
   0x9   : > { %p50_p2 = scmp.eq.s32.totalorder %s776_s23, 0  ;;  %p55_p3 = scmp.ne.s32.totalorder %s760_s19, %s756_s18 }
   0xa   : > { %s1024_s26 = smov (%p35_p0, %s33_s26), 0  ;;  %p56_p5 = scmp.eq.s32.totalorder %s566_s24, 0 }
   0xb   : > { %p855_p4 = por %p50_p2, %p49_p1  ;;  %s37_s29 = ssub.s32 %s772_s22, %s1024_s26 }
   0xc   : > { %p172_p6 = scmp.eq.s32.totalorder %s566_s24, 1  ;;  %p40_p7 = scmp.eq.s32.totalorder %s37_s29, 0 }
   0xd   : > { %p861_p8 = por %p56_p5, %p55_p3  ;;  %p178_p10 = scmp.eq.s32.totalorder %s567_s25, 1 }
   0xe   : > { %p865_p9 = por %p172_p6, %p49_p1  ;;  %p609_p13 = scmp.lt.s32.totalorder %s776_s23, 2 }
   0xf   : > { %s870_s7 = scalar_select %p40_p7, %s764_s20, %s42_s27  }
  0x10   : > { %s1010_s6 = scalar_select %p865_p9, 1, 0 }
  0x11   : > { %p872_p11 = por %p178_p10, %p55_p3  ;;  %s207_s9 = sand.u32 1, %s764_s20  }
  0x12   : > { %s570_s10 = sshll.u32 %s207_s9, 3  ;;  %s571_s11 = sshll.u32 %s772_s22, 7 }
  0x13   : > { %s1011_s8 = scalar_select %p872_p11, 1, 0 }
  0x14   : > { %s883_s14 = scalar_lea.hbm %s1001_s0, %s571_s11  ;;  %s211_s15 = scalar_lea.vmem [#allocation2], %s570_s10 }
  0x15   : > { %s219_s16 = sshll.u32 %s211_s15, 4  ;;  %p889_p0 = pnand %p609_p13, %p855_p4  ;;  %s885_s16 = int_to_ptr.vmem [resolvable:$true] %s219_s16 }
  0x16   : > { %s208_s24 = scalar_lea.sflag [#allocation3], %s207_s9  ;;  %s664_s25 = scalar_lea.hbm %s883_s14, 128 }
  0x17   : > { %p665_p3 = scmp.ne.s32.totalorder %s883_s14, %s664_s25  ;;  %p666_p5 = pneg %p889_p0 }
  0x18   : > { %s669_s28 = scalar_lea.hbm %s1001_s0, 256  ;;  %p670_p4 = scmp.lt.u32.totalorder %s883_s14, %s1001_s0 }
  0x19   : > { %p667_p6 = pnand %p666_p5, %p665_p3  ;;  %p671_p10 = scmp.lt.u32.totalorder %s669_s28, %s664_s25 }
  0x1a   : > { %p673_p12 = scmp.lt.u32.totalorder %s664_s25, %s883_s14 }
  0x1b   : > { %p668_p7 = pneg %p667_p6  ;;  %p672_p13 = por %p671_p10, %p670_p4 }
  0x1d   : > { %p674_p1 = por %p673_p12, %p672_p13 }
  0x1f   : > { %p675_p2 = pnand %p674_p1, %p668_p7 }
  0x21   : > { %678 = shalt.err (!%p675_p2)
}
  0x22   : > { %s679_s9 = scalar_lea.vmem %s885_s16, 128  ;;  %s778_s12 = smov [#allocation2]  }
  0x23   : > { %p680_p3 = scmp.ne.s32.totalorder %s885_s16, %s679_s9  ;;  %s684_s13 = sshll.u32 %s778_s12, 4  ;;  %s685_s13 = int_to_ptr.vmem [resolvable:$false] %s684_s13 }
  0x24   : > { %s686_s15 = scalar_lea.vmem %s685_s13, 256  ;;  %p687_p9 = scmp.lt.s32.totalorder %s885_s16, %s685_s13 }
  0x25   : > { %p682_p6 = pnand %p680_p3, %p666_p5  ;;  %p688_p4 = scmp.lt.s32.totalorder %s686_s15, %s679_s9 }
  0x27   : > { %p683_p11 = pneg %p682_p6  ;;  %p689_p10 = por %p688_p4, %p687_p9 }
  0x29   : > { %p690_p12 = pnand %p689_p10, %p683_p11 }
  0x2b   : > { %693 = shalt.err (!%p690_p12)
}
  0x2c   : > { %604 = dma.hbm_to_vmem [thread:$0]  (!%p889_p0), %s883_s14, 128, %s885_s16, %s208_s24  }
  0x2d   : > { %p1013_p1 = scmp.lt.s32.totalorder %s776_s23, 3  ;;  %p1014_p2 = scmp.ge.s32.totalorder %s776_s23, 1 }
  0x2f   : > { %p235_p5 = pnand %p1014_p2, %p1013_p1 }
  0x30   : > { %s925_s25 = sand.u32 (!%p235_p5), 1, %s760_s19  }
  0x31   : > { %238 = sbr.rel (%p235_p5) target bundleno = 408 (0x198), region = 40  ;;  %s573_s27 = sshll.u32 (!%p235_p5), %s925_s25, 3 }
  0x32   : > { %s241_s29 = scalar_lea.sflag (!%p235_p5), [#allocation3], %s925_s25  ;;  %s244_s28 = scalar_lea.vmem (!%p235_p5), [#allocation2], %s573_s27 }
  0x38   : > { %747 = dma.done.wait (%p861_p8), %s241_s29, 128  }
  0x39   : > { %749 = vsyncadd (%p861_p8), %s241_s29, 4294967168  ;;  %v779_v0 = vmov 0.0   ;;  %vm780_vm0 = vmmov 0   ;;  %v781_v1 = vmov 0   ;;  %vm374_vm1 = vcmask 64512   ;;  %v285_v2 = vld [vmem:[%s244_s28] sm:$0xff] }
  0x3a   : > { %592 = vmatprep.subr.mxu1 %v779_v0  ;;  %587 = vmatprep.subr.mxu0 %v779_v0  ;;  %v294_v3 = vld [vmem:[%s1003_s2] sm:$0xf]  ;;  %v288_v4 = vrot.slane %v285_v2, 4  ;;  %s782_s30 = smov 1   ;;  %p278_p8 = scmp.lt.s32.totalorder %s768_s21, 1  ;;  %vm292_vm2 = vcmask 7168  }
  0x3b   : > { %594 = vmatprep.mubr.msk.f32.mxu1 %vm780_vm0, %v779_v0  ;;  %589 = vmatprep.mubr.msk.f32.mxu0 %vm780_vm0, %v779_v0  ;;  %v448_v5 = vld [vmem:[%s1005_s4] sm:$0xf]  ;;  %vm300_vm3 = vcmask 1043456   ;;  %vm296_vm4 = vcmask 31744   ;;  %s574_s29 = sshll.u32 %s925_s25, 2  ;;  %s580_s28 = sshll.u32 %s768_s21, 6 }
  0x3c   : > { %663 = vset.pattern.permute.xlu0 %v781_v1  ;;  %593 = vmatpush3.msra.mxu1 %v285_v2  ;;  %s279_s10 = scalar_select %p278_p8, %s768_s21, 1  ;;  %v295_v8 = vld [vmem:[%s1004_s3] sm:$0xf] }
  0x3d   : > { %595 = vmatmul.mubr.msk.f32.vlgmr.msra.gmra.mrb[0].mxu1 %vm374_vm1, %v294_v3  ;;  %289 = vrot.lane.b32.xlu0 %v288_v4, %s782_s30  ;;  %s277_s14 = scalar_lea.vmem [#allocation5], %s574_s29  ;;  %s952_s24 = scalar_lea.hbm %s1006_s5, %s580_s28 }
  0x3e   : > { %s575_s11 = sshll.u32 %s279_s10, 2  ;;  %s471_s16 = sshll.u32 %s277_s14, 4  ;;  %s954_s16 = int_to_ptr.vmem [resolvable:$true] %s471_s16 }
  0x3f   : > { %s284_s13 = scalar_lea.vmem %s1002_s1, %s575_s11  ;;  %s457_s10 = scalar_lea.sflag [#allocation4], %s925_s25 }
  0x40   : > { %v286_v6 = vld [vmem:[%s284_s13] sm:$0xf]  ;;  %s694_s11 = scalar_lea.vmem %s954_s16, 64  ;;  %p1015_p11 = scmp.ne.s32.totalorder %s1010_s6, 0 }
  0x41   : > { %451 = vperm.xlu0 %663, %v448_v5   ;;  %p695_p9 = scmp.ne.s32.totalorder %s954_s16, %s694_s11  ;;  %s783_s21 = smov [#allocation5]  }
  0x42   : > { %s698_s9 = sshll.u32 %s783_s21, 4  ;;  %s699_s9 = int_to_ptr.vmem [resolvable:$false] %s698_s9 }
  0x43   : > { %p696_p0 = pnand %p695_p9, %p1015_p11  ;;  %s700_s12 = scalar_lea.vmem %s699_s9, 128 }
  0x44   : > { %p701_p13 = scmp.lt.s32.totalorder %s954_s16, %s699_s9  ;;  %p702_p3 = scmp.lt.s32.totalorder %s700_s12, %s694_s11 }
  0x45   : > { %p697_p7 = pneg %p696_p0 }
  0x46   : > { %p703_p6 = por %p702_p3, %p701_p13 }
  0x48   : > { %p704_p4 = pnand %p703_p6, %p697_p7 }
  0xaf   : > { %v290_v7 = vpop.permute.xlu0 %289 }
  0xb0   : > { %v293_v9 = vsel %vm292_vm2, %v286_v6, %v290_v7 }
  0xb1   : > { %588 = vmatpush3.msk.msra.mxu0 %vm300_vm3, %v293_v9 }
  0xb2   : > { %590 = vmatmul.mubr.msk.f32.vlgmr.msra.gmra.mrb[0].mxu0 %vm296_vm4, %v295_v8 }
  0xc0   : > { %v452_v13 = vpop.permute.xlu0 %451 }
 0x110   : > { %v444_v10 = vpop.f32.mrb[0].mxu1 }
 0x111   : > { %v596_v11 = vpop.f32.mrb[1].mxu1 }
 0x185   : > { %v370_v12 = vpop.f32.mrb[0].mxu0 }
 0x186   : > { %v445_v14 = vadd.f32 %v444_v10, %v370_v12  ;;  %v591_v15 = vpop.f32.mrb[1].mxu0 }
 0x188   : > { %v454_v16 = vadd.f32 %v452_v13, %v445_v14 }
 0x18a   : > { %455 = vst [vmem:[%s277_s14] sm:$0xf] %v454_v16 }
 0x18b   : > { %707 = shalt.err (!%p704_p4)
}
 0x18c   : > { %s708_s25 = scalar_lea.hbm %s952_s24, 64  ;;  %s712_s27 = scalar_lea.hbm %s1006_s5, 128 }
 0x18d   : > { %p709_p10 = scmp.ne.s32.totalorder %s952_s24, %s708_s25  ;;  %p713_p2 = scmp.lt.u32.totalorder %s952_s24, %s1006_s5 }
 0x18e   : > { %p714_p5 = scmp.lt.u32.totalorder %s712_s27, %s708_s25  ;;  %p716_p9 = scmp.lt.u32.totalorder %s708_s25, %s952_s24 }
 0x18f   : > { %p710_p12 = pnand %p709_p10, %p1015_p11 }
 0x190   : > { %p715_p8 = por %p714_p5, %p713_p2 }
 0x191   : > { %p711_p1 = pneg %p710_p12 }
 0x192   : > { %p717_p0 = por %p716_p9, %p715_p8 }
 0x194   : > { %p718_p7 = pnand %p717_p0, %p711_p1 }
 0x196   : > { %721 = shalt.err (!%p718_p7)
}
 0x197   : > { %599 = dma.vmem_to_hbm [thread:$0]  (%p1015_p11), %s954_s16, 64, %s952_s24, %s457_s10  }
 0x198 PF: > { %s483_s14 = sand.u32 1, %s756_s18   ;;  %p1016_p13 = scmp.ne.s32.totalorder %s1011_s8, 0 }
 0x199   : > { %p1017_p3 = scmp.ge.s32.totalorder %s776_s23, 2  ;;  %s484_s30 = scalar_lea.sflag [#allocation4], %s483_s14 }
 0x19b   : > { %p606_p6 = pnand %p1017_p3, %p1016_p13 }
 0x19d   : > { %751 = dma.done.wait (!%p606_p6), %s484_s30, 64  }
 0x19e   : > { %753 = vsyncadd (!%p606_p6), %s484_s30, 4294967232  ;;  %s21_s23 = sadd.s32 1, %s776_s23   ;;  %s1018_s18 = smov %s760_s19 }
 0x19f   : > { %p18_p4 = scmp.ge.s32.totalorder %s21_s23, 4   ;;  %s1019_s19 = smov %s764_s20 }
 0x1a0   : > { %s1020_s20 = smov %s870_s7  ;;  %s1021_s21 = smov %s772_s22 }
 0x1a1   : > { %s1022_s22 = smov %s1024_s26  ;;  %20 = sbr.rel (!%p18_p4) target bundleno = 6 (0x6), region = 88 }
 0x1a8   :  { %489 = vsyncpa [#allocation3], 1 }
 0x1a9   :  { %491 = vsyncpa [#allocation3 + $0x1], 1 }
 0x1aa   :  { %492 = vsyncpa [#allocation4], 1 }
 0x1ab   :  { %494 = vsyncpa [#allocation4 + $0x1], 1 }

</bundles_post_ra>
